<compile_context>
chip_gen: v6e
topology: v6e:2x2x1
jax: 0.10.0
libtpu: 0.0.40
codegen_flags: <defaults>
</compile_context>

<pallas_src>
import jax
import jax.numpy as jnp
from jax import lax
from jax.experimental import pallas as pl
from jax.experimental.pallas import tpu as pltpu

LN_EPS = 1e-5
MXU_DTYPE = jnp.bfloat16  # MXU operand dtype (accumulation stays f32)


def _round_up(x, m):
    return ((x + m - 1) // m) * m


def _layer_norm(y, gamma, beta):
    # Elementwise math stays in f32 (v5e has no bf16 VPU/EUP).
    mu = jnp.mean(y, axis=-1, keepdims=True)
    var = jnp.mean((y - mu) ** 2, axis=-1, keepdims=True)
    return (y - mu) * lax.rsqrt(var + LN_EPS) * gamma + beta


# ----------------------------- fused Pallas kernel -----------------------------

def _fused_gcnet_kernel(patches_ref, pe_w_ref, pe_b_ref, pe_g_ref, pe_beta_ref,
                        wk_ref, w1_ref, b1_ref, ln_g_ref, ln_b_ref,
                        w2_ref, b2_ref, out_w_ref, out_b_ref, o_ref):
    """Whole GCNet forward for B_TILE images; tokens never leave VMEM/vregs."""
    B, L, Kin = patches_ref.shape
    NB, E = wk_ref.shape

    # --- patch embed: (B*L, Kin) @ (Kin, E) fills the MXU M dimension ---
    p = patches_ref[...].reshape(B * L, Kin).astype(MXU_DTYPE)
    tok = jnp.dot(p, pe_w_ref[...], preferred_element_type=jnp.float32)
    tok = _layer_norm(tok + pe_b_ref[...], pe_g_ref[...], pe_beta_ref[...])  # f32
    tok3 = tok.reshape(B, L, E)
    tok3_mx = tok3.astype(MXU_DTYPE)

    # --- all GC-block attention maps at once (channel_add shift-invariance) ---
    # logits: (B, NB, L), L on the lane axis -> lane-dense softmax.
    wk_b = jnp.broadcast_to(wk_ref[...][None], (B, NB, E))          # bf16
    logits = jnp.einsum('bne,ble->bnl', wk_b, tok3_mx,
                        preferred_element_type=jnp.float32)
    m = jnp.max(logits, axis=-1, keepdims=True)
    ex = jnp.exp(logits - m)
    # Exact division (not approx reciprocal): the shift-invariance fusion below
    # relies on each attention map summing to 1.
    attn = ex / jnp.sum(ex, axis=-1, keepdims=True)                  # (B, NB, L) f32

    # all base contexts in one batched MXU call: (B, NB, E)
    base_ctx = jnp.einsum('bnl,ble->bne', attn, tok3,
                          preferred_element_type=jnp.float32)

    # --- sequential (tiny) bottleneck-MLP + cumulative channel_add chain ---
    # Static unroll is fine at NB = sum(DEPTH_EN) = 4; the big matmuls are
    # already hoisted out of this loop by the fusion above.
    cum = jnp.zeros((B, E), jnp.float32)
    for i in range(NB):
        ctx = base_ctx[:, i, :] + cum                                # (B, E)
        h = jnp.dot(ctx.astype(MXU_DTYPE), w1_ref[i],
                    preferred_element_type=jnp.float32) + b1_ref[i]  # (B, Cr)
        h = _layer_norm(h, ln_g_ref[i], ln_b_ref[i])
        h = jnp.maximum(h, 0.0)
        cum = cum + jnp.dot(h.astype(MXU_DTYPE), w2_ref[i],
                            preferred_element_type=jnp.float32) + b2_ref[i]

    # fusion (channel_add): broadcast cumulative context term over all tokens
    tok_out = (tok3 + cum[:, None, :]).reshape(B * L, E)

    # --- output projection, lane-dense (Kout pre-padded to 128 lanes) ---
    out = jnp.dot(tok_out.astype(MXU_DTYPE), out_w_ref[...],
                  preferred_element_type=jnp.float32) + out_b_ref[...]
    o_ref[...] = out.reshape(B, L, out_w_ref.shape[1])


def _pick_b_tile(n):
    """Largest per-step image count that divides n while keeping >= 2 grid
    steps (v7x dual-TC balance).  Capped at 8 to bound per-step VMEM; retune
    the cap together with vmem_limit_bytes for v7x's 64 MiB VMEM at real sizes."""
    if n < 2:
        return 1
    best = 1
    for bt in range(1, min(n // 2, 8) + 1):
        if n % bt == 0:
            best = bt
    return best


def fused_forward(patches, params):
    N, L, Kin = patches.shape
    E = params["pe_w"].shape[1]
    Kout_pad = params["out_w"].shape[1]
    NB, _, Cr = params["w1"].shape

    bt = _pick_b_tile(N)

    def full(shape):
        # Weight blocks never change across grid steps.
        # TODO(synk): opt these out of double-buffering (pipeline_mode) once
        # E/NB grow enough for the duplicate buffer to matter in VMEM.
        nd = len(shape)
        return pl.BlockSpec(shape, lambda b, _nd=nd: (0,) * _nd)

    return pl.pallas_call(
        _fused_gcnet_kernel,
        out_shape=jax.ShapeDtypeStruct((N, L, Kout_pad), jnp.float32),
        grid=(N // bt,),
        in_specs=[
            pl.BlockSpec((bt, L, Kin), lambda b: (b, 0, 0)),    # per-step image batch
            full((Kin, E)), full((1, E)), full((1, E)), full((1, E)),  # patch embed
            full((NB, E)),                                              # GC: attn key conv
            full((NB, E, Cr)), full((NB, 1, Cr)),                       # GC: conv1
            full((NB, 1, Cr)), full((NB, 1, Cr)),                       # GC: LayerNorm
            full((NB, Cr, E)), full((NB, 1, E)),                        # GC: conv2
            full((E, Kout_pad)), full((1, Kout_pad)),                   # output proj (padded)
        ],
        out_specs=pl.BlockSpec((bt, L, Kout_pad), lambda b: (b, 0, 0)),
        compiler_params=pltpu.CompilerParams(
            dimension_semantics=("parallel",),        # shard batch steps across TCs
            vmem_limit_bytes=32 * 1024 * 1024,        # safe on v5e/v6e/v7x
        ),
    )(patches, params["pe_w"], params["pe_b"], params["pe_g"], params["pe_beta"],
      params["wk"], params["w1"], params["b1"], params["ln_g"], params["ln_b"],
      params["w2"], params["b2"], params["out_w"], params["out_b"])


# ------------------------------ model ------------------------------

def init_params(key, config):
    cfg = config["GCNET"]
    P, E = cfg["PATCH_SIZE"], cfg["EMB_DIM"]
    in_chans, out_chans = 3, 3
    Cr = max(1, int(E * cfg["CONTEXT_RATIO"]))
    NB = sum(cfg["DEPTH_EN"])
    Kin = P * P * in_chans
    Kout = P * P * out_chans
    Kout_pad = _round_up(Kout, 128)        # lane-dense output writes
    k_pe, k_out, k_wk, k_w1, k_w2 = jax.random.split(key, 5)

    out_w = 0.02 * jax.random.normal(k_out, (E, Kout), jnp.float32)
    out_w = jnp.pad(out_w, ((0, 0), (0, Kout_pad - Kout)))

    # Matmul weights stored bf16 (MXU-native on v6e/v7x, halves weight bytes);
    # bias / LayerNorm params stay f32 (added to f32 accumulations).
    return {
        # patch embed; flattening order is (ph, pw, c) — consistent with the
        # wrapper's patch extraction (a real Conv2d checkpoint uses (c, ph, pw)).
        "pe_w": (0.02 * jax.random.normal(k_pe, (Kin, E), jnp.float32)).astype(MXU_DTYPE),
        "pe_b": jnp.zeros((1, E), jnp.float32),
        "pe_g": jnp.ones((1, E), jnp.float32),
        "pe_beta": jnp.zeros((1, E), jnp.float32),
        # stacked GC-block weights (one leading dim over all blocks)
        "wk": (0.02 * jax.random.normal(k_wk, (NB, E), jnp.float32)).astype(MXU_DTYPE),
        "w1": (0.02 * jax.random.normal(k_w1, (NB, E, Cr), jnp.float32)).astype(MXU_DTYPE),
        "b1": jnp.zeros((NB, 1, Cr), jnp.float32),
        "ln_g": jnp.ones((NB, 1, Cr), jnp.float32),
        "ln_b": jnp.zeros((NB, 1, Cr), jnp.float32),
        "w2": (0.02 * jax.random.normal(k_w2, (NB, Cr, E), jnp.float32)).astype(MXU_DTYPE),
        "b2": jnp.zeros((NB, 1, E), jnp.float32),
        # output projection, columns zero-padded to a multiple of 128 lanes
        "out_w": out_w.astype(MXU_DTYPE),
        "out_b": jnp.zeros((1, Kout_pad), jnp.float32),
    }


def gcnet_model_forward(params, x_nchw, config):
    cfg = config["GCNET"]
    P = cfg["PATCH_SIZE"]

    # PyTorch wrapper semantics: grayscale -> repeat to 3 channels.
    if x_nchw.shape[1] == 1:
        x_nchw = jnp.tile(x_nchw, (1, 3, 1, 1))

    x = jnp.transpose(x_nchw, (0, 2, 3, 1)).astype(jnp.float32)  # NHWC
    N, H, W, C = x.shape
    Hp, Wp = H // P, W // P
    L = Hp * Wp
    Kout = P * P * 3

    # Non-overlapping PxP patches, flattened in (ph, pw, c) order.
    # TODO(synk): fold this extraction into the Pallas kernel at real image
    # sizes to avoid the extra HBM round-trip of the patch tensor.
    patches = (
        x.reshape(N, Hp, P, Wp, P, C)
         .transpose(0, 1, 3, 2, 4, 5)
         .reshape(N, L, P * P * C)
    )

    out = fused_forward(patches, params)       # (N, L, Kout_pad), lane-dense writes
    out = out[..., :Kout]                      # drop lane padding
    out = (
        out.reshape(N, Hp, Wp, P, P, 3)
           .transpose(0, 1, 3, 2, 4, 5)
           .reshape(N, H, W, 3)
    )
    return jnp.transpose(out, (0, 3, 1, 2))    # back to NCHW logits


# ------------------------------ main ------------------------------

if __name__ == "__main__":
    config = {
        "GCNET": {
            "IMG_SIZE": 16,
            "PATCH_SIZE": 4,
            "EMB_DIM": 32,
            "DEPTH_EN": [2, 2],
            "PATCH_NORM": True,
            "USE_CHECKPOINTS": False,
            "CONTEXT_RATIO": 0.25,
            "POOLING_TYPE": "att",
            "FUSION_TYPES": ("channel_add",),
        }
    }

    key = jax.random.PRNGKey(0)
    pkey, xkey = jax.random.split(key)
    params = init_params(pkey, config)

    # Grayscale input exercises the repeat(1, 3, 1, 1) branch of the wrapper.
    x = jax.random.normal(xkey, (2, 1, 16, 16), dtype=jnp.float32)

    forward = jax.jit(lambda p, inp: gcnet_model_forward(p, inp, config))
    logits = forward(params, x)
    jax.block_until_ready(logits)

    assert logits.shape == (2, 3, 16, 16), logits.shape
    assert logits.dtype == jnp.float32
    print("KERNEL_OK")
</pallas_src>

<mosaic_0001>
module attributes {stable_mosaic.version = 11 : i64} {
  func.func @_fused_gcnet_kernel(%arg0: i32, %arg1: memref<1x16x48xf32, #tpu.memory_space<vmem>>, %arg2: memref<48x32xbf16, #tpu.memory_space<vmem>>, %arg3: memref<1x32xf32, #tpu.memory_space<vmem>>, %arg4: memref<1x32xf32, #tpu.memory_space<vmem>>, %arg5: memref<1x32xf32, #tpu.memory_space<vmem>>, %arg6: memref<4x32xbf16, #tpu.memory_space<vmem>>, %arg7: memref<4x32x8xbf16, #tpu.memory_space<vmem>>, %arg8: memref<4x1x8xf32, #tpu.memory_space<vmem>>, %arg9: memref<4x1x8xf32, #tpu.memory_space<vmem>>, %arg10: memref<4x1x8xf32, #tpu.memory_space<vmem>>, %arg11: memref<4x8x32xbf16, #tpu.memory_space<vmem>>, %arg12: memref<4x1x32xf32, #tpu.memory_space<vmem>>, %arg13: memref<32x128xbf16, #tpu.memory_space<vmem>>, %arg14: memref<1x128xf32, #tpu.memory_space<vmem>>, %arg15: memref<1x16x128xf32, #tpu.memory_space<vmem>>) attributes {dimension_semantics = [#tpu.dimension_semantics<parallel>], iteration_bounds = array<i64: 2>, scalar_prefetch = 0 : i64, scratch_operands = 0 : i64, tpu.core_type = #tpu.core_type<tc>, window_params = [{transform_indices = @transform_0, window_bounds = array<i64: 1, 16, 48>}, {pipeline_mode = #tpu.pipeline_mode<synchronous>, transform_indices = @transform_1, window_bounds = array<i64: 48, 32>}, {pipeline_mode = #tpu.pipeline_mode<synchronous>, transform_indices = @transform_2, window_bounds = array<i64: 1, 32>}, {pipeline_mode = #tpu.pipeline_mode<synchronous>, transform_indices = @transform_3, window_bounds = array<i64: 1, 32>}, {pipeline_mode = #tpu.pipeline_mode<synchronous>, transform_indices = @transform_4, window_bounds = array<i64: 1, 32>}, {pipeline_mode = #tpu.pipeline_mode<synchronous>, transform_indices = @transform_5, window_bounds = array<i64: 4, 32>}, {pipeline_mode = #tpu.pipeline_mode<synchronous>, transform_indices = @transform_6, window_bounds = array<i64: 4, 32, 8>}, {pipeline_mode = #tpu.pipeline_mode<synchronous>, transform_indices = @transform_7, window_bounds = array<i64: 4, 1, 8>}, {pipeline_mode = #tpu.pipeline_mode<synchronous>, transform_indices = @transform_8, window_bounds = array<i64: 4, 1, 8>}, {pipeline_mode = #tpu.pipeline_mode<synchronous>, transform_indices = @transform_9, window_bounds = array<i64: 4, 1, 8>}, {pipeline_mode = #tpu.pipeline_mode<synchronous>, transform_indices = @transform_10, window_bounds = array<i64: 4, 8, 32>}, {pipeline_mode = #tpu.pipeline_mode<synchronous>, transform_indices = @transform_11, window_bounds = array<i64: 4, 1, 32>}, {pipeline_mode = #tpu.pipeline_mode<synchronous>, transform_indices = @transform_12, window_bounds = array<i64: 32, 128>}, {pipeline_mode = #tpu.pipeline_mode<synchronous>, transform_indices = @transform_13, window_bounds = array<i64: 1, 128>}, {transform_indices = @transform_14, window_bounds = array<i64: 1, 16, 128>}]} {
    %c0 = arith.constant 0 : index
    %c0_0 = arith.constant 0 : index
    %c0_1 = arith.constant 0 : index
    %0 = vector.load %arg1[%c0, %c0_0, %c0_1] : memref<1x16x48xf32, #tpu.memory_space<vmem>>, vector<1x16x48xf32>
    %1 = vector.shape_cast %0 : vector<1x16x48xf32> to vector<16x48xf32>
    %2 = arith.truncf %1 : vector<16x48xf32> to vector<16x48xbf16>
    %c0_2 = arith.constant 0 : index
    %c0_3 = arith.constant 0 : index
    %3 = vector.load %arg2[%c0_2, %c0_3] : memref<48x32xbf16, #tpu.memory_space<vmem>>, vector<48x32xbf16>
    %cst = arith.constant dense<0.000000e+00> : vector<16x32xf32>
    %4 = tpu.matmul %2, %3, %cst {dimension_numbers = #tpu.dot_dimension_numbers<[1], [0], [0], [1], [0, 0, 1, 1], [], []>} : vector<16x48xbf16>, vector<48x32xbf16>, vector<16x32xf32> -> vector<16x32xf32>
    %c0_4 = arith.constant 0 : index
    %c0_5 = arith.constant 0 : index
    %5 = vector.load %arg3[%c0_4, %c0_5] : memref<1x32xf32, #tpu.memory_space<vmem>>, vector<1x32xf32>
    %6 = vector.broadcast %5 : vector<1x32xf32> to vector<16x32xf32>
    %7 = arith.addf %4, %6 : vector<16x32xf32>
    %c0_6 = arith.constant 0 : index
    %c0_7 = arith.constant 0 : index
    %8 = vector.load %arg4[%c0_6, %c0_7] : memref<1x32xf32, #tpu.memory_space<vmem>>, vector<1x32xf32>
    %c0_8 = arith.constant 0 : index
    %c0_9 = arith.constant 0 : index
    %9 = vector.load %arg5[%c0_8, %c0_9] : memref<1x32xf32, #tpu.memory_space<vmem>>, vector<1x32xf32>
    %cst_10 = arith.constant dense<0.000000e+00> : vector<16xf32>
    %10 = vector.multi_reduction <add>, %7, %cst_10 [1] : vector<16x32xf32> to vector<16xf32>
    %11 = vector.shape_cast %10 : vector<16xf32> to vector<16x1xf32>
    %cst_11 = arith.constant 3.200000e+01 : f32
    %12 = vector.broadcast %cst_11 : f32 to vector<16x1xf32>
    %13 = arith.divf %11, %12 : vector<16x1xf32>
    %14 = vector.broadcast %13 : vector<16x1xf32> to vector<16x32xf32>
    %15 = arith.subf %7, %14 : vector<16x32xf32>
    %16 = arith.mulf %15, %15 : vector<16x32xf32>
    %cst_12 = arith.constant dense<0.000000e+00> : vector<16xf32>
    %17 = vector.multi_reduction <add>, %16, %cst_12 [1] : vector<16x32xf32> to vector<16xf32>
    %18 = vector.shape_cast %17 : vector<16xf32> to vector<16x1xf32>
    %cst_13 = arith.constant 3.200000e+01 : f32
    %19 = vector.broadcast %cst_13 : f32 to vector<16x1xf32>
    %20 = arith.divf %18, %19 : vector<16x1xf32>
    %21 = vector.broadcast %13 : vector<16x1xf32> to vector<16x32xf32>
    %22 = arith.subf %7, %21 : vector<16x32xf32>
    %cst_14 = arith.constant 9.99999974E-6 : f32
    %23 = vector.broadcast %cst_14 : f32 to vector<16x1xf32>
    %24 = arith.addf %20, %23 : vector<16x1xf32>
    %25 = math.rsqrt %24 : vector<16x1xf32>
    %26 = vector.broadcast %25 : vector<16x1xf32> to vector<16x32xf32>
    %27 = arith.mulf %22, %26 : vector<16x32xf32>
    %28 = vector.broadcast %8 : vector<1x32xf32> to vector<16x32xf32>
    %29 = arith.mulf %27, %28 : vector<16x32xf32>
    %30 = vector.broadcast %9 : vector<1x32xf32> to vector<16x32xf32>
    %31 = arith.addf %29, %30 : vector<16x32xf32>
    %32 = vector.shape_cast %31 : vector<16x32xf32> to vector<1x16x32xf32>
    %33 = arith.truncf %32 : vector<1x16x32xf32> to vector<1x16x32xbf16>
    %c0_15 = arith.constant 0 : index
    %c0_16 = arith.constant 0 : index
    %34 = vector.load %arg6[%c0_15, %c0_16] : memref<4x32xbf16, #tpu.memory_space<vmem>>, vector<4x32xbf16>
    %35 = vector.shape_cast %34 : vector<4x32xbf16> to vector<1x4x32xbf16>
    "tpu.trace_start"() <{level = 10 : i32, message = "bne,ble->bnl"}> : () -> ()
    %cst_17 = arith.constant dense<0.000000e+00> : vector<1x4x16xf32>
    %36 = tpu.matmul %35, %33, %cst_17 {dimension_numbers = #tpu.dot_dimension_numbers<[2], [2], [1], [1], [0, 0, 0, 1, 1, 1], [0], [0]>} : vector<1x4x32xbf16>, vector<1x16x32xbf16>, vector<1x4x16xf32> -> vector<1x4x16xf32>
    "tpu.trace_stop"() : () -> ()
    %cst_18 = arith.constant dense<0xFF800000> : vector<1x4xf32>
    %37 = vector.multi_reduction <maximumf>, %36, %cst_18 [2] : vector<1x4x16xf32> to vector<1x4xf32>
    %38 = vector.shape_cast %37 : vector<1x4xf32> to vector<1x4x1xf32>
    %39 = vector.broadcast %38 : vector<1x4x1xf32> to vector<1x4x16xf32>
    %40 = arith.subf %36, %39 : vector<1x4x16xf32>
    %41 = math.exp %40 : vector<1x4x16xf32>
    %cst_19 = arith.constant dense<0.000000e+00> : vector<1x4xf32>
    %42 = vector.multi_reduction <add>, %41, %cst_19 [2] : vector<1x4x16xf32> to vector<1x4xf32>
    %43 = vector.shape_cast %42 : vector<1x4xf32> to vector<1x4x1xf32>
    %44 = vector.broadcast %43 : vector<1x4x1xf32> to vector<1x4x16xf32>
    %45 = arith.divf %41, %44 : vector<1x4x16xf32>
    "tpu.trace_start"() <{level = 10 : i32, message = "bnl,ble->bne"}> : () -> ()
    %cst_20 = arith.constant dense<0.000000e+00> : vector<1x4x32xf32>
    %46 = tpu.matmul %45, %32, %cst_20 {dimension_numbers = #tpu.dot_dimension_numbers<[2], [1], [1], [2], [0, 0, 0, 1, 1, 2], [0], [0]>} : vector<1x4x16xf32>, vector<1x16x32xf32>, vector<1x4x32xf32> -> vector<1x4x32xf32>
    %cst_21 = arith.constant 0.000000e+00 : f32
    "tpu.trace_stop"() : () -> ()
    %47 = vector.broadcast %cst_21 : f32 to vector<1x32xf32>
    %48 = vector.extract_strided_slice %46 {offsets = [0, 0, 0], sizes = [1, 1, 32], strides = [1, 1, 1]} : vector<1x4x32xf32> to vector<1x1x32xf32>
    %49 = vector.shape_cast %48 : vector<1x1x32xf32> to vector<1x32xf32>
    %50 = arith.addf %49, %47 : vector<1x32xf32>
    %51 = arith.truncf %50 : vector<1x32xf32> to vector<1x32xbf16>
    %c0_22 = arith.constant 0 : index
    %c0_23 = arith.constant 0 : index
    %c0_24 = arith.constant 0 : index
    %52 = vector.load %arg7[%c0_22, %c0_23, %c0_24] : memref<4x32x8xbf16, #tpu.memory_space<vmem>>, vector<1x32x8xbf16>
    %53 = vector.shape_cast %52 : vector<1x32x8xbf16> to vector<32x8xbf16>
    %cst_25 = arith.constant dense<0.000000e+00> : vector<1x8xf32>
    %54 = tpu.matmul %51, %53, %cst_25 {dimension_numbers = #tpu.dot_dimension_numbers<[1], [0], [0], [1], [0, 0, 1, 1], [], []>} : vector<1x32xbf16>, vector<32x8xbf16>, vector<1x8xf32> -> vector<1x8xf32>
    %c0_26 = arith.constant 0 : index
    %c0_27 = arith.constant 0 : index
    %c0_28 = arith.constant 0 : index
    %55 = vector.load %arg8[%c0_26, %c0_27, %c0_28] : memref<4x1x8xf32, #tpu.memory_space<vmem>>, vector<1x1x8xf32>
    %56 = vector.shape_cast %55 : vector<1x1x8xf32> to vector<1x8xf32>
    %57 = arith.addf %54, %56 : vector<1x8xf32>
    %c0_29 = arith.constant 0 : index
    %c0_30 = arith.constant 0 : index
    %c0_31 = arith.constant 0 : index
    %58 = vector.load %arg9[%c0_29, %c0_30, %c0_31] : memref<4x1x8xf32, #tpu.memory_space<vmem>>, vector<1x1x8xf32>
    %59 = vector.shape_cast %58 : vector<1x1x8xf32> to vector<1x8xf32>
    %c0_32 = arith.constant 0 : index
    %c0_33 = arith.constant 0 : index
    %c0_34 = arith.constant 0 : index
    %60 = vector.load %arg10[%c0_32, %c0_33, %c0_34] : memref<4x1x8xf32, #tpu.memory_space<vmem>>, vector<1x1x8xf32>
    %61 = vector.shape_cast %60 : vector<1x1x8xf32> to vector<1x8xf32>
    %cst_35 = arith.constant dense<0.000000e+00> : vector<1xf32>
    %62 = vector.multi_reduction <add>, %57, %cst_35 [1] : vector<1x8xf32> to vector<1xf32>
    %63 = vector.shape_cast %62 : vector<1xf32> to vector<1x1xf32>
    %cst_36 = arith.constant 8.000000e+00 : f32
    %64 = vector.broadcast %cst_36 : f32 to vector<1x1xf32>
    %65 = arith.divf %63, %64 : vector<1x1xf32>
    %66 = vector.broadcast %65 : vector<1x1xf32> to vector<1x8xf32>
    %67 = arith.subf %57, %66 : vector<1x8xf32>
    %68 = arith.mulf %67, %67 : vector<1x8xf32>
    %cst_37 = arith.constant dense<0.000000e+00> : vector<1xf32>
    %69 = vector.multi_reduction <add>, %68, %cst_37 [1] : vector<1x8xf32> to vector<1xf32>
    %70 = vector.shape_cast %69 : vector<1xf32> to vector<1x1xf32>
    %cst_38 = arith.constant 8.000000e+00 : f32
    %71 = vector.broadcast %cst_38 : f32 to vector<1x1xf32>
    %72 = arith.divf %70, %71 : vector<1x1xf32>
    %73 = vector.broadcast %65 : vector<1x1xf32> to vector<1x8xf32>
    %74 = arith.subf %57, %73 : vector<1x8xf32>
    %cst_39 = arith.constant 9.99999974E-6 : f32
    %75 = vector.broadcast %cst_39 : f32 to vector<1x1xf32>
    %76 = arith.addf %72, %75 : vector<1x1xf32>
    %77 = math.rsqrt %76 : vector<1x1xf32>
    %78 = vector.broadcast %77 : vector<1x1xf32> to vector<1x8xf32>
    %79 = arith.mulf %74, %78 : vector<1x8xf32>
    %80 = arith.mulf %79, %59 : vector<1x8xf32>
    %81 = arith.addf %80, %61 : vector<1x8xf32>
    %cst_40 = arith.constant 0.000000e+00 : f32
    %82 = vector.broadcast %cst_40 : f32 to vector<1x8xf32>
    %83 = arith.maximumf %81, %82 : vector<1x8xf32>
    %84 = arith.truncf %83 : vector<1x8xf32> to vector<1x8xbf16>
    %c0_41 = arith.constant 0 : index
    %c0_42 = arith.constant 0 : index
    %c0_43 = arith.constant 0 : index
    %85 = vector.load %arg11[%c0_41, %c0_42, %c0_43] : memref<4x8x32xbf16, #tpu.memory_space<vmem>>, vector<1x8x32xbf16>
    %86 = vector.shape_cast %85 : vector<1x8x32xbf16> to vector<8x32xbf16>
    %cst_44 = arith.constant dense<0.000000e+00> : vector<1x32xf32>
    %87 = tpu.matmul %84, %86, %cst_44 {dimension_numbers = #tpu.dot_dimension_numbers<[1], [0], [0], [1], [0, 0, 1, 1], [], []>} : vector<1x8xbf16>, vector<8x32xbf16>, vector<1x32xf32> -> vector<1x32xf32>
    %88 = arith.addf %47, %87 : vector<1x32xf32>
    %c0_45 = arith.constant 0 : index
    %c0_46 = arith.constant 0 : index
    %c0_47 = arith.constant 0 : index
    %89 = vector.load %arg12[%c0_45, %c0_46, %c0_47] : memref<4x1x32xf32, #tpu.memory_space<vmem>>, vector<1x1x32xf32>
    %90 = vector.shape_cast %89 : vector<1x1x32xf32> to vector<1x32xf32>
    %91 = arith.addf %88, %90 : vector<1x32xf32>
    %92 = vector.extract_strided_slice %46 {offsets = [0, 1, 0], sizes = [1, 1, 32], strides = [1, 1, 1]} : vector<1x4x32xf32> to vector<1x1x32xf32>
    %93 = vector.shape_cast %92 : vector<1x1x32xf32> to vector<1x32xf32>
    %94 = arith.addf %93, %91 : vector<1x32xf32>
    %95 = arith.truncf %94 : vector<1x32xf32> to vector<1x32xbf16>
    %c1 = arith.constant 1 : index
    %c0_48 = arith.constant 0 : index
    %c0_49 = arith.constant 0 : index
    %96 = vector.load %arg7[%c1, %c0_48, %c0_49] : memref<4x32x8xbf16, #tpu.memory_space<vmem>>, vector<1x32x8xbf16>
    %97 = vector.shape_cast %96 : vector<1x32x8xbf16> to vector<32x8xbf16>
    %cst_50 = arith.constant dense<0.000000e+00> : vector<1x8xf32>
    %98 = tpu.matmul %95, %97, %cst_50 {dimension_numbers = #tpu.dot_dimension_numbers<[1], [0], [0], [1], [0, 0, 1, 1], [], []>} : vector<1x32xbf16>, vector<32x8xbf16>, vector<1x8xf32> -> vector<1x8xf32>
    %c1_51 = arith.constant 1 : index
    %c0_52 = arith.constant 0 : index
    %c0_53 = arith.constant 0 : index
    %99 = vector.load %arg8[%c1_51, %c0_52, %c0_53] : memref<4x1x8xf32, #tpu.memory_space<vmem>>, vector<1x1x8xf32>
    %100 = vector.shape_cast %99 : vector<1x1x8xf32> to vector<1x8xf32>
    %101 = arith.addf %98, %100 : vector<1x8xf32>
    %c1_54 = arith.constant 1 : index
    %c0_55 = arith.constant 0 : index
    %c0_56 = arith.constant 0 : index
    %102 = vector.load %arg9[%c1_54, %c0_55, %c0_56] : memref<4x1x8xf32, #tpu.memory_space<vmem>>, vector<1x1x8xf32>
    %103 = vector.shape_cast %102 : vector<1x1x8xf32> to vector<1x8xf32>
    %c1_57 = arith.constant 1 : index
    %c0_58 = arith.constant 0 : index
    %c0_59 = arith.constant 0 : index
    %104 = vector.load %arg10[%c1_57, %c0_58, %c0_59] : memref<4x1x8xf32, #tpu.memory_space<vmem>>, vector<1x1x8xf32>
    %105 = vector.shape_cast %104 : vector<1x1x8xf32> to vector<1x8xf32>
    %cst_60 = arith.constant dense<0.000000e+00> : vector<1xf32>
    %106 = vector.multi_reduction <add>, %101, %cst_60 [1] : vector<1x8xf32> to vector<1xf32>
    %107 = vector.shape_cast %106 : vector<1xf32> to vector<1x1xf32>
    %cst_61 = arith.constant 8.000000e+00 : f32
    %108 = vector.broadcast %cst_61 : f32 to vector<1x1xf32>
    %109 = arith.divf %107, %108 : vector<1x1xf32>
    %110 = vector.broadcast %109 : vector<1x1xf32> to vector<1x8xf32>
    %111 = arith.subf %101, %110 : vector<1x8xf32>
    %112 = arith.mulf %111, %111 : vector<1x8xf32>
    %cst_62 = arith.constant dense<0.000000e+00> : vector<1xf32>
    %113 = vector.multi_reduction <add>, %112, %cst_62 [1] : vector<1x8xf32> to vector<1xf32>
    %114 = vector.shape_cast %113 : vector<1xf32> to vector<1x1xf32>
    %cst_63 = arith.constant 8.000000e+00 : f32
    %115 = vector.broadcast %cst_63 : f32 to vector<1x1xf32>
    %116 = arith.divf %114, %115 : vector<1x1xf32>
    %117 = vector.broadcast %109 : vector<1x1xf32> to vector<1x8xf32>
    %118 = arith.subf %101, %117 : vector<1x8xf32>
    %cst_64 = arith.constant 9.99999974E-6 : f32
    %119 = vector.broadcast %cst_64 : f32 to vector<1x1xf32>
    %120 = arith.addf %116, %119 : vector<1x1xf32>
    %121 = math.rsqrt %120 : vector<1x1xf32>
    %122 = vector.broadcast %121 : vector<1x1xf32> to vector<1x8xf32>
    %123 = arith.mulf %118, %122 : vector<1x8xf32>
    %124 = arith.mulf %123, %103 : vector<1x8xf32>
    %125 = arith.addf %124, %105 : vector<1x8xf32>
    %cst_65 = arith.constant 0.000000e+00 : f32
    %126 = vector.broadcast %cst_65 : f32 to vector<1x8xf32>
    %127 = arith.maximumf %125, %126 : vector<1x8xf32>
    %128 = arith.truncf %127 : vector<1x8xf32> to vector<1x8xbf16>
    %c1_66 = arith.constant 1 : index
    %c0_67 = arith.constant 0 : index
    %c0_68 = arith.constant 0 : index
    %129 = vector.load %arg11[%c1_66, %c0_67, %c0_68] : memref<4x8x32xbf16, #tpu.memory_space<vmem>>, vector<1x8x32xbf16>
    %130 = vector.shape_cast %129 : vector<1x8x32xbf16> to vector<8x32xbf16>
    %cst_69 = arith.constant dense<0.000000e+00> : vector<1x32xf32>
    %131 = tpu.matmul %128, %130, %cst_69 {dimension_numbers = #tpu.dot_dimension_numbers<[1], [0], [0], [1], [0, 0, 1, 1], [], []>} : vector<1x8xbf16>, vector<8x32xbf16>, vector<1x32xf32> -> vector<1x32xf32>
    %132 = arith.addf %91, %131 : vector<1x32xf32>
    %c1_70 = arith.constant 1 : index
    %c0_71 = arith.constant 0 : index
    %c0_72 = arith.constant 0 : index
    %133 = vector.load %arg12[%c1_70, %c0_71, %c0_72] : memref<4x1x32xf32, #tpu.memory_space<vmem>>, vector<1x1x32xf32>
    %134 = vector.shape_cast %133 : vector<1x1x32xf32> to vector<1x32xf32>
    %135 = arith.addf %132, %134 : vector<1x32xf32>
    %136 = vector.extract_strided_slice %46 {offsets = [0, 2, 0], sizes = [1, 1, 32], strides = [1, 1, 1]} : vector<1x4x32xf32> to vector<1x1x32xf32>
    %137 = vector.shape_cast %136 : vector<1x1x32xf32> to vector<1x32xf32>
    %138 = arith.addf %137, %135 : vector<1x32xf32>
    %139 = arith.truncf %138 : vector<1x32xf32> to vector<1x32xbf16>
    %c2 = arith.constant 2 : index
    %c0_73 = arith.constant 0 : index
    %c0_74 = arith.constant 0 : index
    %140 = vector.load %arg7[%c2, %c0_73, %c0_74] : memref<4x32x8xbf16, #tpu.memory_space<vmem>>, vector<1x32x8xbf16>
    %141 = vector.shape_cast %140 : vector<1x32x8xbf16> to vector<32x8xbf16>
    %cst_75 = arith.constant dense<0.000000e+00> : vector<1x8xf32>
    %142 = tpu.matmul %139, %141, %cst_75 {dimension_numbers = #tpu.dot_dimension_numbers<[1], [0], [0], [1], [0, 0, 1, 1], [], []>} : vector<1x32xbf16>, vector<32x8xbf16>, vector<1x8xf32> -> vector<1x8xf32>
    %c2_76 = arith.constant 2 : index
    %c0_77 = arith.constant 0 : index
    %c0_78 = arith.constant 0 : index
    %143 = vector.load %arg8[%c2_76, %c0_77, %c0_78] : memref<4x1x8xf32, #tpu.memory_space<vmem>>, vector<1x1x8xf32>
    %144 = vector.shape_cast %143 : vector<1x1x8xf32> to vector<1x8xf32>
    %145 = arith.addf %142, %144 : vector<1x8xf32>
    %c2_79 = arith.constant 2 : index
    %c0_80 = arith.constant 0 : index
    %c0_81 = arith.constant 0 : index
    %146 = vector.load %arg9[%c2_79, %c0_80, %c0_81] : memref<4x1x8xf32, #tpu.memory_space<vmem>>, vector<1x1x8xf32>
    %147 = vector.shape_cast %146 : vector<1x1x8xf32> to vector<1x8xf32>
    %c2_82 = arith.constant 2 : index
    %c0_83 = arith.constant 0 : index
    %c0_84 = arith.constant 0 : index
    %148 = vector.load %arg10[%c2_82, %c0_83, %c0_84] : memref<4x1x8xf32, #tpu.memory_space<vmem>>, vector<1x1x8xf32>
    %149 = vector.shape_cast %148 : vector<1x1x8xf32> to vector<1x8xf32>
    %cst_85 = arith.constant dense<0.000000e+00> : vector<1xf32>
    %150 = vector.multi_reduction <add>, %145, %cst_85 [1] : vector<1x8xf32> to vector<1xf32>
    %151 = vector.shape_cast %150 : vector<1xf32> to vector<1x1xf32>
    %cst_86 = arith.constant 8.000000e+00 : f32
    %152 = vector.broadcast %cst_86 : f32 to vector<1x1xf32>
    %153 = arith.divf %151, %152 : vector<1x1xf32>
    %154 = vector.broadcast %153 : vector<1x1xf32> to vector<1x8xf32>
    %155 = arith.subf %145, %154 : vector<1x8xf32>
    %156 = arith.mulf %155, %155 : vector<1x8xf32>
    %cst_87 = arith.constant dense<0.000000e+00> : vector<1xf32>
    %157 = vector.multi_reduction <add>, %156, %cst_87 [1] : vector<1x8xf32> to vector<1xf32>
    %158 = vector.shape_cast %157 : vector<1xf32> to vector<1x1xf32>
    %cst_88 = arith.constant 8.000000e+00 : f32
    %159 = vector.broadcast %cst_88 : f32 to vector<1x1xf32>
    %160 = arith.divf %158, %159 : vector<1x1xf32>
    %161 = vector.broadcast %153 : vector<1x1xf32> to vector<1x8xf32>
    %162 = arith.subf %145, %161 : vector<1x8xf32>
    %cst_89 = arith.constant 9.99999974E-6 : f32
    %163 = vector.broadcast %cst_89 : f32 to vector<1x1xf32>
    %164 = arith.addf %160, %163 : vector<1x1xf32>
    %165 = math.rsqrt %164 : vector<1x1xf32>
    %166 = vector.broadcast %165 : vector<1x1xf32> to vector<1x8xf32>
    %167 = arith.mulf %162, %166 : vector<1x8xf32>
    %168 = arith.mulf %167, %147 : vector<1x8xf32>
    %169 = arith.addf %168, %149 : vector<1x8xf32>
    %cst_90 = arith.constant 0.000000e+00 : f32
    %170 = vector.broadcast %cst_90 : f32 to vector<1x8xf32>
    %171 = arith.maximumf %169, %170 : vector<1x8xf32>
    %172 = arith.truncf %171 : vector<1x8xf32> to vector<1x8xbf16>
    %c2_91 = arith.constant 2 : index
    %c0_92 = arith.constant 0 : index
    %c0_93 = arith.constant 0 : index
    %173 = vector.load %arg11[%c2_91, %c0_92, %c0_93] : memref<4x8x32xbf16, #tpu.memory_space<vmem>>, vector<1x8x32xbf16>
    %174 = vector.shape_cast %173 : vector<1x8x32xbf16> to vector<8x32xbf16>
    %cst_94 = arith.constant dense<0.000000e+00> : vector<1x32xf32>
    %175 = tpu.matmul %172, %174, %cst_94 {dimension_numbers = #tpu.dot_dimension_numbers<[1], [0], [0], [1], [0, 0, 1, 1], [], []>} : vector<1x8xbf16>, vector<8x32xbf16>, vector<1x32xf32> -> vector<1x32xf32>
    %176 = arith.addf %135, %175 : vector<1x32xf32>
    %c2_95 = arith.constant 2 : index
    %c0_96 = arith.constant 0 : index
    %c0_97 = arith.constant 0 : index
    %177 = vector.load %arg12[%c2_95, %c0_96, %c0_97] : memref<4x1x32xf32, #tpu.memory_space<vmem>>, vector<1x1x32xf32>
    %178 = vector.shape_cast %177 : vector<1x1x32xf32> to vector<1x32xf32>
    %179 = arith.addf %176, %178 : vector<1x32xf32>
    %180 = vector.extract_strided_slice %46 {offsets = [0, 3, 0], sizes = [1, 1, 32], strides = [1, 1, 1]} : vector<1x4x32xf32> to vector<1x1x32xf32>
    %181 = vector.shape_cast %180 : vector<1x1x32xf32> to vector<1x32xf32>
    %182 = arith.addf %181, %179 : vector<1x32xf32>
    %183 = arith.truncf %182 : vector<1x32xf32> to vector<1x32xbf16>
    %c3 = arith.constant 3 : index
    %c0_98 = arith.constant 0 : index
    %c0_99 = arith.constant 0 : index
    %184 = vector.load %arg7[%c3, %c0_98, %c0_99] : memref<4x32x8xbf16, #tpu.memory_space<vmem>>, vector<1x32x8xbf16>
    %185 = vector.shape_cast %184 : vector<1x32x8xbf16> to vector<32x8xbf16>
    %cst_100 = arith.constant dense<0.000000e+00> : vector<1x8xf32>
    %186 = tpu.matmul %183, %185, %cst_100 {dimension_numbers = #tpu.dot_dimension_numbers<[1], [0], [0], [1], [0, 0, 1, 1], [], []>} : vector<1x32xbf16>, vector<32x8xbf16>, vector<1x8xf32> -> vector<1x8xf32>
    %c3_101 = arith.constant 3 : index
    %c0_102 = arith.constant 0 : index
    %c0_103 = arith.constant 0 : index
    %187 = vector.load %arg8[%c3_101, %c0_102, %c0_103] : memref<4x1x8xf32, #tpu.memory_space<vmem>>, vector<1x1x8xf32>
    %188 = vector.shape_cast %187 : vector<1x1x8xf32> to vector<1x8xf32>
    %189 = arith.addf %186, %188 : vector<1x8xf32>
    %c3_104 = arith.constant 3 : index
    %c0_105 = arith.constant 0 : index
    %c0_106 = arith.constant 0 : index
    %190 = vector.load %arg9[%c3_104, %c0_105, %c0_106] : memref<4x1x8xf32, #tpu.memory_space<vmem>>, vector<1x1x8xf32>
    %191 = vector.shape_cast %190 : vector<1x1x8xf32> to vector<1x8xf32>
    %c3_107 = arith.constant 3 : index
    %c0_108 = arith.constant 0 : index
    %c0_109 = arith.constant 0 : index
    %192 = vector.load %arg10[%c3_107, %c0_108, %c0_109] : memref<4x1x8xf32, #tpu.memory_space<vmem>>, vector<1x1x8xf32>
    %193 = vector.shape_cast %192 : vector<1x1x8xf32> to vector<1x8xf32>
    %cst_110 = arith.constant dense<0.000000e+00> : vector<1xf32>
    %194 = vector.multi_reduction <add>, %189, %cst_110 [1] : vector<1x8xf32> to vector<1xf32>
    %195 = vector.shape_cast %194 : vector<1xf32> to vector<1x1xf32>
    %cst_111 = arith.constant 8.000000e+00 : f32
    %196 = vector.broadcast %cst_111 : f32 to vector<1x1xf32>
    %197 = arith.divf %195, %196 : vector<1x1xf32>
    %198 = vector.broadcast %197 : vector<1x1xf32> to vector<1x8xf32>
    %199 = arith.subf %189, %198 : vector<1x8xf32>
    %200 = arith.mulf %199, %199 : vector<1x8xf32>
    %cst_112 = arith.constant dense<0.000000e+00> : vector<1xf32>
    %201 = vector.multi_reduction <add>, %200, %cst_112 [1] : vector<1x8xf32> to vector<1xf32>
    %202 = vector.shape_cast %201 : vector<1xf32> to vector<1x1xf32>
    %cst_113 = arith.constant 8.000000e+00 : f32
    %203 = vector.broadcast %cst_113 : f32 to vector<1x1xf32>
    %204 = arith.divf %202, %203 : vector<1x1xf32>
    %205 = vector.broadcast %197 : vector<1x1xf32> to vector<1x8xf32>
    %206 = arith.subf %189, %205 : vector<1x8xf32>
    %cst_114 = arith.constant 9.99999974E-6 : f32
    %207 = vector.broadcast %cst_114 : f32 to vector<1x1xf32>
    %208 = arith.addf %204, %207 : vector<1x1xf32>
    %209 = math.rsqrt %208 : vector<1x1xf32>
    %210 = vector.broadcast %209 : vector<1x1xf32> to vector<1x8xf32>
    %211 = arith.mulf %206, %210 : vector<1x8xf32>
    %212 = arith.mulf %211, %191 : vector<1x8xf32>
    %213 = arith.addf %212, %193 : vector<1x8xf32>
    %cst_115 = arith.constant 0.000000e+00 : f32
    %214 = vector.broadcast %cst_115 : f32 to vector<1x8xf32>
    %215 = arith.maximumf %213, %214 : vector<1x8xf32>
    %216 = arith.truncf %215 : vector<1x8xf32> to vector<1x8xbf16>
    %c3_116 = arith.constant 3 : index
    %c0_117 = arith.constant 0 : index
    %c0_118 = arith.constant 0 : index
    %217 = vector.load %arg11[%c3_116, %c0_117, %c0_118] : memref<4x8x32xbf16, #tpu.memory_space<vmem>>, vector<1x8x32xbf16>
    %218 = vector.shape_cast %217 : vector<1x8x32xbf16> to vector<8x32xbf16>
    %cst_119 = arith.constant dense<0.000000e+00> : vector<1x32xf32>
    %219 = tpu.matmul %216, %218, %cst_119 {dimension_numbers = #tpu.dot_dimension_numbers<[1], [0], [0], [1], [0, 0, 1, 1], [], []>} : vector<1x8xbf16>, vector<8x32xbf16>, vector<1x32xf32> -> vector<1x32xf32>
    %220 = arith.addf %179, %219 : vector<1x32xf32>
    %c3_120 = arith.constant 3 : index
    %c0_121 = arith.constant 0 : index
    %c0_122 = arith.constant 0 : index
    %221 = vector.load %arg12[%c3_120, %c0_121, %c0_122] : memref<4x1x32xf32, #tpu.memory_space<vmem>>, vector<1x1x32xf32>
    %222 = vector.shape_cast %221 : vector<1x1x32xf32> to vector<1x32xf32>
    %223 = arith.addf %220, %222 : vector<1x32xf32>
    %224 = vector.shape_cast %223 : vector<1x32xf32> to vector<1x1x32xf32>
    %225 = vector.broadcast %224 : vector<1x1x32xf32> to vector<1x16x32xf32>
    %226 = arith.addf %32, %225 : vector<1x16x32xf32>
    %227 = vector.shape_cast %226 : vector<1x16x32xf32> to vector<16x32xf32>
    %228 = arith.truncf %227 : vector<16x32xf32> to vector<16x32xbf16>
    %c0_123 = arith.constant 0 : index
    %c0_124 = arith.constant 0 : index
    %229 = vector.load %arg13[%c0_123, %c0_124] : memref<32x128xbf16, #tpu.memory_space<vmem>>, vector<32x128xbf16>
    %cst_125 = arith.constant dense<0.000000e+00> : vector<16x128xf32>
    %230 = tpu.matmul %228, %229, %cst_125 {dimension_numbers = #tpu.dot_dimension_numbers<[1], [0], [0], [1], [0, 0, 1, 1], [], []>} : vector<16x32xbf16>, vector<32x128xbf16>, vector<16x128xf32> -> vector<16x128xf32>
    %c0_126 = arith.constant 0 : index
    %c0_127 = arith.constant 0 : index
    %231 = vector.load %arg14[%c0_126, %c0_127] : memref<1x128xf32, #tpu.memory_space<vmem>>, vector<1x128xf32>
    %232 = vector.broadcast %231 : vector<1x128xf32> to vector<16x128xf32>
    %233 = arith.addf %230, %232 : vector<16x128xf32>
    %234 = vector.shape_cast %233 : vector<16x128xf32> to vector<1x16x128xf32>
    %c0_128 = arith.constant 0 : index
    %c0_129 = arith.constant 0 : index
    %c0_130 = arith.constant 0 : index
    %235 = vector.load %arg15[%c0_128, %c0_129, %c0_130] : memref<1x16x128xf32, #tpu.memory_space<vmem>>, vector<1x16x128xf32>
    tpu.vector_store %arg15[%c0_128, %c0_129, %c0_130], %234 {strides = array<i32>} : memref<1x16x128xf32, #tpu.memory_space<vmem>>, vector<1x16x128xf32>,
    return
  }
  func.func @transform_0(%arg0: i32) -> (i32, i32, i32) {
    %c0_i32 = arith.constant 0 : i32
    %c0_i32_0 = arith.constant 0 : i32
    %c0_i32_1 = arith.constant 0 : i32
    return %arg0, %c0_i32, %c0_i32_0 : i32, i32, i32
  }
  func.func @transform_1(%arg0: i32) -> (i32, i32) {
    %c0_i32 = arith.constant 0 : i32
    %c0_i32_0 = arith.constant 0 : i32
    %c0_i32_1 = arith.constant 0 : i32
    return %c0_i32, %c0_i32_0 : i32, i32
  }
  func.func @transform_2(%arg0: i32) -> (i32, i32) {
    %c0_i32 = arith.constant 0 : i32
    %c0_i32_0 = arith.constant 0 : i32
    %c0_i32_1 = arith.constant 0 : i32
    return %c0_i32, %c0_i32_0 : i32, i32
  }
  func.func @transform_3(%arg0: i32) -> (i32, i32) {
    %c0_i32 = arith.constant 0 : i32
    %c0_i32_0 = arith.constant 0 : i32
    %c0_i32_1 = arith.constant 0 : i32
    return %c0_i32, %c0_i32_0 : i32, i32
  }
  func.func @transform_4(%arg0: i32) -> (i32, i32) {
    %c0_i32 = arith.constant 0 : i32
    %c0_i32_0 = arith.constant 0 : i32
    %c0_i32_1 = arith.constant 0 : i32
    return %c0_i32, %c0_i32_0 : i32, i32
  }
  func.func @transform_5(%arg0: i32) -> (i32, i32) {
    %c0_i32 = arith.constant 0 : i32
    %c0_i32_0 = arith.constant 0 : i32
    %c0_i32_1 = arith.constant 0 : i32
    return %c0_i32, %c0_i32_0 : i32, i32
  }
  func.func @transform_6(%arg0: i32) -> (i32, i32, i32) {
    %c0_i32 = arith.constant 0 : i32
    %c0_i32_0 = arith.constant 0 : i32
    %c0_i32_1 = arith.constant 0 : i32
    %c0_i32_2 = arith.constant 0 : i32
    return %c0_i32, %c0_i32_0, %c0_i32_1 : i32, i32, i32
  }
  func.func @transform_7(%arg0: i32) -> (i32, i32, i32) {
    %c0_i32 = arith.constant 0 : i32
    %c0_i32_0 = arith.constant 0 : i32
    %c0_i32_1 = arith.constant 0 : i32
    %c0_i32_2 = arith.constant 0 : i32
    return %c0_i32, %c0_i32_0, %c0_i32_1 : i32, i32, i32
  }
  func.func @transform_8(%arg0: i32) -> (i32, i32, i32) {
    %c0_i32 = arith.constant 0 : i32
    %c0_i32_0 = arith.constant 0 : i32
    %c0_i32_1 = arith.constant 0 : i32
    %c0_i32_2 = arith.constant 0 : i32
    return %c0_i32, %c0_i32_0, %c0_i32_1 : i32, i32, i32
  }
  func.func @transform_9(%arg0: i32) -> (i32, i32, i32) {
    %c0_i32 = arith.constant 0 : i32
    %c0_i32_0 = arith.constant 0 : i32
    %c0_i32_1 = arith.constant 0 : i32
    %c0_i32_2 = arith.constant 0 : i32
    return %c0_i32, %c0_i32_0, %c0_i32_1 : i32, i32, i32
  }
  func.func @transform_10(%arg0: i32) -> (i32, i32, i32) {
    %c0_i32 = arith.constant 0 : i32
    %c0_i32_0 = arith.constant 0 : i32
    %c0_i32_1 = arith.constant 0 : i32
    %c0_i32_2 = arith.constant 0 : i32
    return %c0_i32, %c0_i32_0, %c0_i32_1 : i32, i32, i32
  }
  func.func @transform_11(%arg0: i32) -> (i32, i32, i32) {
    %c0_i32 = arith.constant 0 : i32
    %c0_i32_0 = arith.constant 0 : i32
    %c0_i32_1 = arith.constant 0 : i32
    %c0_i32_2 = arith.constant 0 : i32
    return %c0_i32, %c0_i32_0, %c0_i32_1 : i32, i32, i32
  }
  func.func @transform_12(%arg0: i32) -> (i32, i32) {
    %c0_i32 = arith.constant 0 : i32
    %c0_i32_0 = arith.constant 0 : i32
    %c0_i32_1 = arith.constant 0 : i32
    return %c0_i32, %c0_i32_0 : i32, i32
  }
  func.func @transform_13(%arg0: i32) -> (i32, i32) {
    %c0_i32 = arith.constant 0 : i32
    %c0_i32_0 = arith.constant 0 : i32
    %c0_i32_1 = arith.constant 0 : i32
    return %c0_i32, %c0_i32_0 : i32, i32
  }
  func.func @transform_14(%arg0: i32) -> (i32, i32, i32) {
    %c0_i32 = arith.constant 0 : i32
    %c0_i32_0 = arith.constant 0 : i32
    %c0_i32_1 = arith.constant 0 : i32
    return %arg0, %c0_i32, %c0_i32_0 : i32, i32, i32
  }
}

</mosaic_0001>

<bundles_post_ra>
// kernel: _lambda_.1
= control target key start
LH: loop header
LB: loop body
LE: loop exit
PB: predicated region body
PF: predicated region fallthrough
CT: control target
= control target key end

     0   :  { %s1733_s29 = smov 0   ;;  %s1959_s0 = inlined_call_operand.vmem [shape: f32[2,16,48], index: 0, kind: input, shape index: {}]   ;;  %s1960_s1 = inlined_call_operand.vmem [shape: bf16[48,32], index: 1, kind: input, shape index: {}]   ;;  %s1961_s2 = inlined_call_operand.vmem [shape: f32[1,32], index: 2, kind: input, shape index: {}]   ;;  %s1962_s3 = inlined_call_operand.vmem [shape: f32[1,32], index: 3, kind: input, shape index: {}]   ;;  %s1963_s4 = inlined_call_operand.vmem [shape: f32[1,32], index: 4, kind: input, shape index: {}]   ;;  %s1964_s5 = inlined_call_operand.vmem [shape: bf16[4,32], index: 5, kind: input, shape index: {}]   ;;  %s1965_s6 = inlined_call_operand.vmem [shape: bf16[4,32,8], index: 6, kind: input, shape index: {}]   ;;  %s1966_s7 = inlined_call_operand.vmem [shape: f32[4,1,8], index: 7, kind: input, shape index: {}]   ;;  %s1967_s8 = inlined_call_operand.vmem [shape: f32[4,1,8], index: 8, kind: input, shape index: {}]   ;;  %s1968_s9 = inlined_call_operand.vmem [shape: f32[4,1,8], index: 9, kind: input, shape index: {}]   ;;  %s1969_s10 = inlined_call_operand.vmem [shape: bf16[4,8,32], index: 10, kind: input, shape index: {}]   ;;  %s1970_s11 = inlined_call_operand.vmem [shape: f32[4,1,32], index: 11, kind: input, shape index: {}]   ;;  %s1971_s12 = inlined_call_operand.vmem [shape: bf16[32,128], index: 12, kind: input, shape index: {}]   ;;  %s1972_s13 = inlined_call_operand.vmem [shape: f32[1,128], index: 13, kind: input, shape index: {}]   ;;  %s1973_s14 = inlined_call_operand.vmem [shape: f32[2,16,128], index: 14, kind: output, shape index: {}]  }
   0x1 LB: > { %s1421_s30 = sadd.s32 4294967295, %s1654_s29   ;;  %p1425_p0 = scmp.ge.s32.totalorder %s1654_s29, 1  ;;  %s1654_s29 = sphi %s1733_s29, %s24_s29  }
   0x2   : > { %p412_p1 = scmp.lt.s32.totalorder %s1654_s29, 3 }
   0x4   : > { %p413_p2 = pnand %p1425_p0, %p412_p1 }
   0x5   : > { %p458_p3 = scmp.lt.s32.totalorder (!%p413_p2), %s1421_s30, 1 }
   0x6   : > { %416 = sbr.rel (%p413_p2) target bundleno = 4287 (0x10bf), region = 76 }
   0xb   : > { %v1619_v0 = vld [vmem:[%s1960_s1 + $0x10] sm:$0xff]   ;;  %v1656_v1 = vmov 0.0   ;;  %v1620_v2 = vld [vmem:[%s1960_s1 + $0x8] sm:$0xff]   ;;  %vm1657_vm0 = vmmov 0   ;;  %s1975_s30 = smov (!%p458_p3, %s1421_s30), 1  ;;  %v1621_v3 = vld [vmem:[%s1960_s1] sm:$0xff]  }
   0xc   : > { %1522 = vmatprep.subr.bf16.mxu0 %v1656_v1  ;;  %1532 = vmatprep.subr.bf16.mxu1 %v1656_v1  ;;  %s1488_s21 = sshll.u32 %s1975_s30, 4  ;;  %vm503_vm1 = vcmask 392192   ;;  %v1430_v7 = vld [vmem:[%s1961_s2] ss:$0 sm:$0xff]  ;;  %vm550_vm2 = vcmask 261120   ;;  %vm642_vm3 = vcmask 125952  }
   0xd   : > { %1523 = vmatpush3.bf16.msra.mxu0 %v1619_v0  ;;  %1528 = vmatprep.mubr.msk.bf16.mxu0 %vm1657_vm0, %v1656_v1  ;;  %s462_s24 = scalar_lea.vmem %s1959_s0, %s1488_s21  ;;  %v1435_v34 = vld [vmem:[%s1962_s3] ss:$0 sm:$0xff]  ;;  %v1622_v55 = vld [vmem:[%s1965_s6 + $0x8] sm:$0xff]   ;;  %vm654_vm4 = vcmask 130048   ;;  %vm792_vm5 = vcmask 57344   ;;  %vm817_vm6 = vcmask 1043456   ;;  %s467_s18 = scalar_lea.vmem %s1973_s14, %s1488_s21 }
   0xe   : > { %1524 = vmatprep.subr.bf16.mxu0 %v1656_v1  ;;  %1534 = vmatprep.mubr.msk.bf16.mxu1 %vm1657_vm0, %v1656_v1  ;;  %v469_v4 = vld [vmem:[%s462_s24] sm:$0xff]  ;;  %v470_v5 = vld [vmem:[%s462_s24 + $0x8] sm:$0xff]  ;;  %vm813_vm7 = vcmask 64512  }
   0xf   : > { %v471_v6 = vpack.c.bf16 %v470_v5, %v469_v4  ;;  %v1436_v38 = vld [vmem:[%s1963_s4] ss:$0 sm:$0xff] }
  0x10   : > { %v595_v44 = vld [vmem:[%s1964_s5] sm:$0x3] }
  0x11   : > { %1525 = vmatpush3.bf16.msra.mxu0 %v1620_v2  ;;  %v1623_v56 = vld [vmem:[%s1965_s6] sm:$0xff]  }
  0x12   : > { %1526 = vmatprep.subr.bf16.mxu0 %v1656_v1  ;;  %v734_v63 = vld [vmem:[%s1966_s7] sm:$0x1] }
  0x15   : > { %1527 = vmatpush3.bf16.msra.mxu0 %v1621_v3 }
  0x16   : > { %1545 = vmatprep.subr.bf16.mxu0 %v1656_v1 }
  0x18   : > { %1529 = vmatmul.mubr.msk.bf16.vlgmr.msra.gmra.mxu0 %vm503_vm1, %v471_v6 }
  0x19   : > { %1549 = vmatprep.mubr.msk.bf16.mxu0 %vm1657_vm0, %v1656_v1  ;;  %1546 = vmatpush3.bf16.msra.mxu0 %v1622_v55 }
  0x1a   : > { %1547 = vmatprep.subr.bf16.mxu0 %v1656_v1 }
  0x1d   : > { %1548 = vmatpush3.bf16.msra.mxu0 %v1623_v56 }
  0x1e   : > { %1559 = vmatprep.subr.bf16.mxu0 %v1656_v1 }
  0xd8   : > { %v541_v8 = vpop.f32.mrf.mxu0 }
  0xd9   : > { %v542_v9 = vadd.f32 %v1430_v7, %v541_v8 }
  0xda   : > { %v1530_v10 = vpop.f32.mrf.mxu0 }
  0xdb   : > { %v551_v11 = vsel %vm550_vm2, %v542_v9, 0.0 }
  0xdc   : > { %552 = vadd.xlane.f32.xlu0 %v551_v11  ;;  %v544_v12 = vpop.f32.mrf.mxu0 }
  0xdd   : > { %v545_v13 = vadd.f32 %v1430_v7, %v544_v12  ;;  %v811_v12 = vld [vmem:[%s1969_s10] sm:$0xf] }
  0xde   : > { %v1531_v14 = vpop.f32.mrf.mxu0 }
  0xdf   : > { %v554_v15 = vsel %vm550_vm2, %v545_v13, 0.0 }
  0xe0   : > { %555 = vadd.xlane.f32.xlu0 %v554_v15 }
 0x165   : > { %v553_v16 = vpop.xlane.xlu0 %552 }
 0x166   : > { %v558_v17 = vmul.f32 0.03125, %v553_v16 }
 0x168   : > { %v560_v18 = vsub.f32 %v542_v9, %v558_v17 }
 0x169   : > { %v556_v19 = vpop.xlane.xlu0 %555 }
 0x16a   : > { %v559_v20 = vmul.f32 0.03125, %v556_v19  ;;  %v562_v21 = vmul.f32 %v560_v18, %v560_v18 }
 0x16c   : > { %v561_v22 = vsub.f32 %v545_v13, %v559_v20  ;;  %v564_v23 = vsel %vm550_vm2, %v562_v21, 0.0  ;;  %v819_v13 = vsel %vm817_vm6, %v811_v12, 0  ;;  %v791_v20 = vld [vmem:[%s1968_s9] sm:$0x1] }
 0x16d   : > { %565 = vadd.xlane.f32.xlu1 %v564_v23 }
 0x16e   : > { %v563_v24 = vmul.f32 %v561_v22, %v561_v22 }
 0x170   : > { %v567_v25 = vsel %vm550_vm2, %v563_v24, 0.0 }
 0x171   : > { %568 = vadd.xlane.f32.xlu1 %v567_v25  ;;  %v1624_v25 = vld [vmem:[%s1965_s6 + $0x18] sm:$0xff]  }
 0x1f6   : > { %v566_v26 = vpop.xlane.xlu1 %565 }
 0x1f7   : > { %v570_v27 = vmul.f32 0.03125, %v566_v26  ;;  %v1625_v26 = vld [vmem:[%s1965_s6 + $0x10] sm:$0xff]  }
 0x1f9   : > { %v572_v28 = vadd.f32 1e-05, %v570_v27  ;;  %v812_v27 = vld [vmem:[%s1970_s11] sm:$0x1] }
 0x1fa   : > { %v569_v29 = vpop.xlane.xlu1 %568 }
 0x1fb   : > { %1632 = vrsqrt.f32 %v572_v28  ;;  %v571_v30 = vmul.f32 0.03125, %v569_v29 }
 0x1fd   : > { %v573_v31 = vadd.f32 1e-05, %v571_v30 }
 0x1ff   : > { %1634 = vrsqrt.f32 %v573_v31 }
 0x208   : > { %v1633_v32 = vpop.eup %1632 }
 0x209   : > { %v576_v33 = vmul.f32 %v1633_v32, %v560_v18  ;;  %v790_v18 = vld [vmem:[%s1967_s8] sm:$0x1] }
 0x20b   : > { %v584_v37 = vmul.f32 %v1435_v34, %v576_v33 }
 0x20c   : > { %v1635_v35 = vpop.eup %1634 }
 0x20d   : > { %v577_v36 = vmul.f32 %v1635_v35, %v561_v22  ;;  %v1782_v40 = vadd.f32 %v1436_v38, %v584_v37  ;;  %v1447_v37 = vld [vmem:[%s1966_s7 + $0x1] sm:$0x1] }
 0x20f   : > { %v585_v39 = vmul.f32 %v1435_v34, %v577_v36 }
 0x211   : > { %v1784_v41 = vadd.f32 %v1436_v38, %v585_v39 }
 0x213   : > { %v594_v42 = vpack.c.bf16 %v1784_v41, %v1782_v40 }
 0x215   : > { %v600_v43 = vsel %vm550_vm2, %v594_v42, 0 }
 0x216   : > { %1533 = vmatpush3.bf16.xpose.msra.mxu1 %v600_v43 }
 0x217   : > { %1538 = vmatprep.subr.mxu1 %v1656_v1 }
 0x21d   : > { %1535 = vmatmul.mubr.msk.bf16.vlgmr.msra.gmra.mxu1 %vm550_vm2, %v595_v44 }
 0x21e   : > { %1539 = vmatpush3.msra.mxu1 %v1784_v41  ;;  %1542 = vmatprep.mubr.msk.f32.mxu1 %vm1657_vm0, %v1656_v1 }
 0x21f   : > { %1540 = vmatprep.subr.mxu1 %v1656_v1 }
 0x220   : > { %1541 = vmatpush3.msra.mxu1 %v1782_v40 }
 0x221   : > { %1553 = vmatprep.subr.bf16.mxu1 %v1656_v1 }
 0x2dd   : > { %v636_v45 = vpop.f32.mrf.mxu1 }
 0x2de   : > { %v643_v46 = vsel %vm642_vm3, %v636_v45, -inf }
 0x2df   : > { %644 = vmax.xlane.f32.xlu0 %v643_v46  ;;  %v1536_v47 = vpop.f32.mrf.mxu1 }
 0x2e1   : > { %v639_v48 = vpop.f32.mrf.mxu1 }
 0x2e3   : > { %v1537_v49 = vpop.f32.mrf.mxu1 }
 0x368   : > { %v645_v50 = vpop.xlane.xlu0 %644 }
 0x369   : > { %v646_v51 = vsub.f32 %v636_v45, %v645_v50 }
 0x36b   : > { %v647_v52 = vmul.f32 1.442695, %v646_v51  ;;  %v1453_v51 = vld [vmem:[%s1969_s10 + $0x4] sm:$0xf] }
 0x36d   : > { %1636 = vpow2.f32 %v647_v52  ;;  %v958_v52 = vsel %vm817_vm6, %v1453_v51, 0 }
 0x37a   : > { %v1637_v53 = vpop.eup %1636 }
 0x37b   : > { %v649_v54 = vsel %vm642_vm3, %v1637_v53, 0.0 }
 0x37c   : > { %650 = vadd.xlane.f32.xlu1 %v649_v54 }
 0x405   : > { %v651_v57 = vpop.xlane.xlu1 %650 }
 0x406   : > { %1638 = vrcp.f32 %v651_v57  ;;  %v1451_v57 = vld [vmem:[%s1967_s8 + $0x1] sm:$0x1] }
 0x413   : > { %v1639_v58 = vpop.eup %1638 }
 0x414   : > { %v653_v59 = vmul.f32 %v1639_v58, %v1637_v53 }
 0x416   : > { %1543 = vmatmul.mubr.msk.f32.vlgmr.msra.gmra.mxu1 %vm654_vm4, %v653_v59  ;;  %v1452_v59 = vld [vmem:[%s1968_s9 + $0x1] sm:$0x1] }
 0x417   : > { %1555 = vmatprep.mubr.msk.bf16.mxu1 %vm1657_vm0, %v1656_v1  ;;  %1554 = vmatpush3.bf16.msra.mxu1 %v819_v13 }
 0x418   : > { %1567 = vmatprep.subr.bf16.mxu1 %v1656_v1 }
 0x4d6   : > { %v1810_v60 = vpop.f32.mrf.mxu1 }
 0x4d7   : > { %v729_v61 = vpack.c.bf16 %v1810_v60, %v1810_v60 }
 0x4d8   : > { %v1544_v62 = vpop.f32.mrf.mxu1 }
 0x4d9   : > { %1550 = vmatmul.mubr.msk.bf16.vlgmr.msra.gmra.mxu0 %vm550_vm2, %v729_v61 }
 0x4da   : > { %1563 = vmatprep.mubr.msk.bf16.mxu0 %vm1657_vm0, %v1656_v1  ;;  %1560 = vmatpush3.bf16.msra.mxu0 %v1624_v25 }
 0x4db   : > { %1561 = vmatprep.subr.bf16.mxu0 %v1656_v1 }
 0x4de   : > { %1562 = vmatpush3.bf16.msra.mxu0 %v1625_v26 }
 0x4df   : > { %1573 = vmatprep.subr.bf16.mxu0 %v1656_v1 }
 0x599   : > { %v784_v0 = vpop.f32.mrf.mxu0 }
 0x59a   : > { %v785_v2 = vadd.f32 %v784_v0, %v734_v63 }
 0x59b   : > { %v1551_v3 = vpop.f32.mrf.mxu0 }
 0x59c   : > { %v793_v4 = vsel %vm792_vm5, %v785_v2, 0.0  ;;  %v1627_v3 = vld [vmem:[%s1965_s6 + $0x20] sm:$0xff]  }
 0x59d   : > { %794 = vadd.xlane.f32.xlu0 %v793_v4  ;;  %v787_v5 = vpop.f32.mrf.mxu0 }
 0x59e   : > { %v1455_v5 = vld [vmem:[%s1970_s11 + $0x1] sm:$0x1] }
 0x59f   : > { %v1552_v6 = vpop.f32.mrf.mxu0 }
 0x626   : > { %v795_v7 = vpop.xlane.xlu0 %794 }
 0x627   : > { %v797_v8 = vmul.f32 0.125, %v795_v7 }
 0x629   : > { %v798_v9 = vsub.f32 %v785_v2, %v797_v8  ;;  %v1626_v2 = vld [vmem:[%s1965_s6 + $0x28] sm:$0xff]  }
 0x62b   : > { %v799_v10 = vmul.f32 %v798_v9, %v798_v9 }
 0x62d   : > { %v800_v11 = vsel %vm792_vm5, %v799_v10, 0.0 }
 0x62e   : > { %801 = vadd.xlane.f32.xlu1 %v800_v11 }
 0x6b7   : > { %v802_v14 = vpop.xlane.xlu1 %801 }
 0x6b8   : > { %v803_v15 = vmul.f32 0.125, %v802_v14 }
 0x6ba   : > { %v804_v16 = vadd.f32 1e-05, %v803_v15  ;;  %v1460_v15 = vld [vmem:[%s1966_s7 + $0x2] sm:$0x1] }
 0x6bc   : > { %1640 = vrsqrt.f32 %v804_v16 }
 0x6c9   : > { %v1641_v17 = vpop.eup %1640 }
 0x6ca   : > { %v806_v19 = vmul.f32 %v1641_v17, %v798_v9 }
 0x6cc   : > { %v807_v21 = vmul.f32 %v806_v19, %v790_v18 }
 0x6ce   : > { %v808_v22 = vadd.f32 %v807_v21, %v791_v20 }
 0x6d0   : > { %v809_v23 = vmax.f32 %v808_v22, 0.0 }
 0x6d2   : > { %v810_v24 = vpack.c.bf16 %v809_v23, %v809_v23 }
 0x6d4   : > { %1556 = vmatmul.mubr.msk.bf16.vlgmr.msra.gmra.mxu1 %vm813_vm7, %v810_v24 }
 0x6d5   : > { %1569 = vmatprep.mubr.msk.bf16.mxu1 %vm1657_vm0, %v1656_v1  ;;  %1568 = vmatpush3.bf16.msra.mxu1 %v958_v52 }
 0x6d6   : > { %1581 = vmatprep.subr.bf16.mxu1 %v1656_v1 }
 0x794   : > { %v855_v28 = vpop.f32.mrf.mxu1 }
 0x795   : > { %v856_v29 = vadd.f32 %v855_v28, %v812_v27  ;;  %v1466_v27 = vld [vmem:[%s1969_s10 + $0x8] sm:$0xf] }
 0x796   : > { %v1557_v30 = vpop.f32.mrf.mxu1  ;;  %v1100_v28 = vsel %vm817_vm6, %v1466_v27, 0 }
 0x797   : > { %v862_v31 = vrot.slane %v856_v29, 7 }
 0x798   : > { %v858_v32 = vpop.f32.mrf.mxu1 }
 0x799   : > { %v864_v33 = vadd.f32 %v862_v31, %v1810_v60 }
 0x79a   : > { %v1558_v34 = vpop.f32.mrf.mxu1 }
 0x79b   : > { %v865_v35 = vpack.c.bf16 %v864_v33, %v864_v33  ;;  %v1464_v33 = vld [vmem:[%s1967_s8 + $0x2] sm:$0x1] }
 0x79d   : > { %v874_v36 = vshrl.u32 %v865_v35, 16  ;;  %v1465_v35 = vld [vmem:[%s1968_s9 + $0x2] sm:$0x1] }
 0x79f   : > { %1564 = vmatmul.mubr.msk.bf16.vlgmr.msra.gmra.mxu0 %vm550_vm2, %v874_v36 }
 0x7a0   : > { %1577 = vmatprep.mubr.msk.bf16.mxu0 %vm1657_vm0, %v1656_v1  ;;  %1574 = vmatpush3.bf16.msra.mxu0 %v1626_v2 }
 0x7a1   : > { %1575 = vmatprep.subr.bf16.mxu0 %v1656_v1 }
 0x7a4   : > { %1576 = vmatpush3.bf16.msra.mxu0 %v1627_v3 }
 0x7a5   : > { %1587 = vmatprep.subr.bf16.mxu0 %v1656_v1 }
 0x85f   : > { %v925_v38 = vpop.f32.mrf.mxu0 }
 0x860   : > { %v926_v39 = vadd.f32 %v1447_v37, %v925_v38 }
 0x861   : > { %v1565_v42 = vpop.f32.mrf.mxu0 }
 0x862   : > { %v935_v43 = vsel %vm792_vm5, %v926_v39, 0.0  ;;  %v1628_v42 = vld [vmem:[%s1965_s6 + $0x38] sm:$0xff]  }
 0x863   : > { %936 = vadd.xlane.f32.xlu0 %v935_v43  ;;  %v928_v44 = vpop.f32.mrf.mxu0  ;;  %v1629_v43 = vld [vmem:[%s1965_s6 + $0x30] sm:$0xff]  }
 0x865   : > { %v1566_v45 = vpop.f32.mrf.mxu0 }
 0x866   : > { %v1468_v45 = vld [vmem:[%s1970_s11 + $0x2] sm:$0x1] }
 0x8ec   : > { %v937_v46 = vpop.xlane.xlu0 %936 }
 0x8ed   : > { %v938_v47 = vmul.f32 0.125, %v937_v46 }
 0x8ef   : > { %v939_v48 = vsub.f32 %v926_v39, %v938_v47 }
 0x8f1   : > { %v940_v49 = vmul.f32 %v939_v48, %v939_v48 }
 0x8f3   : > { %v941_v50 = vsel %vm792_vm5, %v940_v49, 0.0 }
 0x8f4   : > { %942 = vadd.xlane.f32.xlu1 %v941_v50 }
 0x97d   : > { %v943_v53 = vpop.xlane.xlu1 %942 }
 0x97e   : > { %v944_v54 = vmul.f32 0.125, %v943_v53 }
 0x980   : > { %v945_v55 = vadd.f32 1e-05, %v944_v54 }
 0x982   : > { %1642 = vrsqrt.f32 %v945_v55 }
 0x98f   : > { %v1643_v56 = vpop.eup %1642 }
 0x990   : > { %v947_v58 = vmul.f32 %v1643_v56, %v939_v48  ;;  %v1473_v56 = vld [vmem:[%s1966_s7 + $0x3] sm:$0x1] }
 0x992   : > { %v948_v61 = vmul.f32 %v1451_v57, %v947_v58 }
 0x994   : > { %v949_v62 = vadd.f32 %v1452_v59, %v948_v61 }
 0x996   : > { %v950_v63 = vmax.f32 %v949_v62, 0.0 }
 0x998   : > { %v951_v0 = vpack.c.bf16 %v950_v63, %v950_v63 }
 0x99a   : > { %1570 = vmatmul.mubr.msk.bf16.vlgmr.msra.gmra.mxu1 %vm813_vm7, %v951_v0 }
 0x99b   : > { %1583 = vmatprep.mubr.msk.bf16.mxu1 %vm1657_vm0, %v1656_v1  ;;  %1582 = vmatpush3.bf16.msra.mxu1 %v1100_v28 }
 0x99c   : > { %1595 = vmatprep.subr.bf16.mxu1 %v1656_v1 }
 0xa5a   : > { %v994_v4 = vpop.f32.mrf.mxu1 }
 0xa5b   : > { %v1000_v6 = vadd.f32 %v994_v4, %v856_v29 }
 0xa5c   : > { %v1571_v7 = vpop.f32.mrf.mxu1 }
 0xa5d   : > { %v1003_v8 = vadd.f32 %v1455_v5, %v1000_v6  ;;  %v1479_v5 = vld [vmem:[%s1969_s10 + $0xc] sm:$0xf] }
 0xa5e   : > { %v997_v9 = vpop.f32.mrf.mxu1  ;;  %v1244_v6 = vsel %vm817_vm6, %v1479_v5, 0 }
 0xa5f   : > { %v1005_v10 = vrot.slane %v1003_v8, 6 }
 0xa60   : > { %v1572_v11 = vpop.f32.mrf.mxu1 }
 0xa61   : > { %v1007_v12 = vadd.f32 %v1005_v10, %v1810_v60  ;;  %v1477_v11 = vld [vmem:[%s1967_s8 + $0x3] sm:$0x1] }
 0xa63   : > { %v1008_v13 = vpack.c.bf16 %v1007_v12, %v1007_v12 }
 0xa65   : > { %v1017_v14 = vrot.slane %v1008_v13, 1  ;;  %v1478_v13 = vld [vmem:[%s1968_s9 + $0x3] sm:$0x1] }
 0xa67   : > { %1578 = vmatmul.mubr.msk.bf16.vlgmr.msra.gmra.mxu0 %vm550_vm2, %v1017_v14 }
 0xa68   : > { %1591 = vmatprep.mubr.msk.bf16.mxu0 %vm1657_vm0, %v1656_v1  ;;  %1588 = vmatpush3.bf16.msra.mxu0 %v1628_v42 }
 0xa69   : > { %1589 = vmatprep.subr.bf16.mxu0 %v1656_v1 }
 0xa6c   : > { %1590 = vmatpush3.bf16.msra.mxu0 %v1629_v43 }
 0xa6d   : > { %1601 = vmatprep.subr.bf16.mxu0 %v1656_v1 }
 0xb27   : > { %v1067_v16 = vpop.f32.mrf.mxu0 }
 0xb28   : > { %v1068_v17 = vadd.f32 %v1460_v15, %v1067_v16 }
 0xb29   : > { %v1579_v18 = vpop.f32.mrf.mxu0 }
 0xb2a   : > { %v1077_v19 = vsel %vm792_vm5, %v1068_v17, 0.0  ;;  %v1630_v18 = vld [vmem:[%s1971_s12 + $0x8] sm:$0xff]  }
 0xb2b   : > { %1078 = vadd.xlane.f32.xlu0 %v1077_v19  ;;  %v1070_v20 = vpop.f32.mrf.mxu0  ;;  %v1631_v19 = vld [vmem:[%s1971_s12] sm:$0xff]  }
 0xb2c   : > { %v1290_v20 = vlaneseq }
 0xb2d   : > { %v1580_v21 = vpop.f32.mrf.mxu0 }
 0xb2e   : > { %v1291_v21 = vshrl.u32 %v1290_v20, 7 }
 0xbb4   : > { %v1079_v22 = vpop.xlane.xlu0 %1078 }
 0xbb5   : > { %v1080_v23 = vmul.f32 0.125, %v1079_v22 }
 0xbb7   : > { %v1081_v24 = vsub.f32 %v1068_v17, %v1080_v23  ;;  %v1481_v23 = vld [vmem:[%s1970_s11 + $0x3] sm:$0x1] }
 0xbb9   : > { %v1082_v25 = vmul.f32 %v1081_v24, %v1081_v24 }
 0xbbb   : > { %v1083_v26 = vsel %vm792_vm5, %v1082_v25, 0.0  ;;  %v1292_v25 = vsub.s32 0, %v1291_v21 }
 0xbbc   : > { %1084 = vadd.xlane.f32.xlu1 %v1083_v26 }
 0xc45   : > { %v1085_v29 = vpop.xlane.xlu1 %1084 }
 0xc46   : > { %v1086_v30 = vmul.f32 0.125, %v1085_v29 }
 0xc48   : > { %v1087_v31 = vadd.f32 1e-05, %v1086_v30 }
 0xc4a   : > { %1644 = vrsqrt.f32 %v1087_v31 }
 0xc57   : > { %v1645_v32 = vpop.eup %1644 }
 0xc58   : > { %v1089_v34 = vmul.f32 %v1645_v32, %v1081_v24 }
 0xc5a   : > { %v1090_v36 = vmul.f32 %v1464_v33, %v1089_v34  ;;  %v1482_v33 = vld [vmem:[%s1972_s13] ss:$0 sm:$0xff] }
 0xc5c   : > { %v1091_v37 = vadd.f32 %v1465_v35, %v1090_v36 }
 0xc5e   : > { %v1092_v38 = vmax.f32 %v1091_v37, 0.0 }
 0xc60   : > { %v1093_v39 = vpack.c.bf16 %v1092_v38, %v1092_v38 }
 0xc62   : > { %1584 = vmatmul.mubr.msk.bf16.vlgmr.msra.gmra.mxu1 %vm813_vm7, %v1093_v39 }
 0xc63   : > { %1597 = vmatprep.mubr.msk.bf16.mxu1 %vm1657_vm0, %v1656_v1  ;;  %1596 = vmatpush3.bf16.msra.mxu1 %v1244_v6 }
 0xd22   : > { %v1136_v44 = vpop.f32.mrf.mxu1 }
 0xd23   : > { %v1142_v46 = vadd.f32 %v1136_v44, %v1003_v8 }
 0xd24   : > { %v1585_v47 = vpop.f32.mrf.mxu1 }
 0xd25   : > { %v1145_v48 = vadd.f32 %v1468_v45, %v1142_v46 }
 0xd26   : > { %v1139_v49 = vpop.f32.mrf.mxu1 }
 0xd27   : > { %v1147_v50 = vrot.slane %v1145_v48, 5 }
 0xd28   : > { %v1586_v51 = vpop.f32.mrf.mxu1 }
 0xd29   : > { %v1149_v52 = vadd.f32 %v1147_v50, %v1810_v60 }
 0xd2b   : > { %v1150_v53 = vpack.c.bf16 %v1149_v52, %v1149_v52 }
 0xd2d   : > { %v1159_v54 = vshrl.u32 %v1150_v53, 16 }
 0xd2f   : > { %v1161_v55 = vrot.slane %v1159_v54, 1 }
 0xd31   : > { %1592 = vmatmul.mubr.msk.bf16.vlgmr.msra.gmra.mxu0 %vm550_vm2, %v1161_v55 }
 0xd32   : > { %1605 = vmatprep.mubr.msk.bf16.mxu0 %vm1657_vm0, %v1656_v1  ;;  %1602 = vmatpush3.bf16.msra.mxu0 %v1630_v18 }
 0xd33   : > { %1603 = vmatprep.subr.bf16.mxu0 %v1656_v1 }
 0xd36   : > { %1604 = vmatpush3.bf16.msra.mxu0 %v1631_v19 }
 0xdf1   : > { %v1211_v57 = vpop.f32.mrf.mxu0 }
 0xdf2   : > { %v1212_v58 = vadd.f32 %v1473_v56, %v1211_v57 }
 0xdf3   : > { %v1593_v59 = vpop.f32.mrf.mxu0 }
 0xdf4   : > { %v1221_v61 = vsel %vm792_vm5, %v1212_v58, 0.0 }
 0xdf5   : > { %1222 = vadd.xlane.f32.xlu0 %v1221_v61  ;;  %v1214_v62 = vpop.f32.mrf.mxu0 }
 0xdf7   : > { %v1594_v60 = vpop.f32.mrf.mxu0 }
 0xe7e   : > { %v1223_v63 = vpop.xlane.xlu0 %1222 }
 0xe7f   : > { %v1224_v0 = vmul.f32 0.125, %v1223_v63 }
 0xe81   : > { %v1225_v2 = vsub.f32 %v1212_v58, %v1224_v0 }
 0xe83   : > { %v1226_v3 = vmul.f32 %v1225_v2, %v1225_v2 }
 0xe85   : > { %v1227_v4 = vsel %vm792_vm5, %v1226_v3, 0.0 }
 0xe86   : > { %1228 = vadd.xlane.f32.xlu1 %v1227_v4 }
 0xf0f   : > { %v1229_v7 = vpop.xlane.xlu1 %1228 }
 0xf10   : > { %v1230_v8 = vmul.f32 0.125, %v1229_v7 }
 0xf12   : > { %v1231_v9 = vadd.f32 1e-05, %v1230_v8 }
 0xf14   : > { %1646 = vrsqrt.f32 %v1231_v9 }
 0xf21   : > { %v1647_v10 = vpop.eup %1646 }
 0xf22   : > { %v1233_v12 = vmul.f32 %v1647_v10, %v1225_v2 }
 0xf24   : > { %v1234_v14 = vmul.f32 %v1477_v11, %v1233_v12 }
 0xf26   : > { %v1235_v15 = vadd.f32 %v1478_v13, %v1234_v14 }
 0xf28   : > { %v1236_v16 = vmax.f32 %v1235_v15, 0.0 }
 0xf2a   : > { %v1237_v17 = vpack.c.bf16 %v1236_v16, %v1236_v16 }
 0xf2c   : > { %1598 = vmatmul.mubr.msk.bf16.vlgmr.msra.gmra.mxu1 %vm813_vm7, %v1237_v17 }
 0xfec   : > { %v1280_v22 = vpop.f32.mrf.mxu1 }
 0xfed   : > { %v1286_v24 = vadd.f32 %v1280_v22, %v1145_v48 }
 0xfee   : > { %v1599_v26 = vpop.f32.mrf.mxu1 }
 0xfef   : > { %v1289_v27 = vadd.f32 %v1481_v23, %v1286_v24 }
 0xff0   : > { %v1283_v28 = vpop.f32.mrf.mxu1 }
 0xff1   : > { %v1293_v29 = vrot.slane %v1289_v27, %v1292_v25 }
 0xff2   : > { %v1600_v1 = vpop.f32.mrf.mxu1 }
 0xff3   : > { %v1294_v30 = vadd.f32 %v1293_v29, %v1782_v40  ;;  %v1295_v31 = vadd.f32 %v1293_v29, %v1784_v41 }
 0xff5   : > { %v1296_v32 = vpack.c.bf16 %v1295_v31, %v1294_v30 }
 0xff7   : > { %1606 = vmatmul.mubr.msk.bf16.vlgmr.msra.gmra.mxu0 %vm550_vm2, %v1296_v32 }
0x10b7   : > { %v1357_v34 = vpop.f32.mrf.mxu0 }
0x10b8   : > { %v1358_v35 = vadd.f32 %v1482_v33, %v1357_v34 }
0x10b9   : > { %v1607_v36 = vpop.f32.mrf.mxu0 }
0x10ba   : > { %1364 = vst [vmem:[%s467_s18] sm:$0xff] %v1358_v35 }
0x10bb   : > { %v1360_v37 = vpop.f32.mrf.mxu0 }
0x10bc   : > { %v1361_v40 = vadd.f32 %v1482_v33, %v1360_v37 }
0x10bd   : > { %v1608_v38 = vpop.f32.mrf.mxu0 }
0x10be   : > { %1365 = vst [vmem:[%s467_s18 + $0x8] sm:$0xff] %v1361_v40 }
0x10bf PF: > { %s24_s29 = sadd.s32 1, %s1654_s29  }
0x10c0   : > { %p21_p4 = scmp.ge.s32.totalorder %s24_s29, 4  }
0x10c2   :  { %23 = sbr.rel (!%p21_p4) target bundleno = 1 (0x1), region = 124 }

</bundles_post_ra>
